<compile_context>
chip_gen: v7x
topology: tpu7x:2x2x1
jax: 0.10.0
libtpu: 0.0.40
codegen_flags: <defaults>
</compile_context>

<pallas_src>
import jax
import jax.numpy as jnp
from jax.experimental import pallas as pl
from jax.experimental.pallas import tpu as pltpu


def _pooling_kernel(planes_ref, expand_ref, convw_ref, convb_ref,
                    cls_ref, fcw_ref, fcb_ref,
                    conv_out_ref, cls_out_ref, xrep_ref):
    """One batch tile.

    planes_ref : (bt, 4*hh*wh, C_in)  flattened parity planes of the padded input
    expand_ref : (C_in, C_out)        one-hot groups=C_in replication matrix
    convw_ref  : (3, 3, 1, C_out)     depthwise taps, channel on lanes
    convb_ref  : (1, C_out)
    cls_ref    : (bt, T, C_in)
    fcw_ref    : (C_in, C_out)        pre-transposed Linear weight
    fcb_ref    : (1, C_out)
    xrep_ref   : (bt, 4*hh*wh, C_out) f32 VMEM scratch (expanded planes)
    """
    bt, h_out, w_out, c_out = conv_out_ref.shape
    c_in = planes_ref.shape[-1]
    hh, wh = h_out + 1, w_out + 1

    # ---- 1) channel expansion C_in -> C_out, once per block (MXU) ----
    for b in range(bt):                                   # bt is small & static
        if c_out == c_in:
            xrep_ref[b] = planes_ref[b].astype(jnp.float32)
        else:
            xrep_ref[b] = jnp.dot(planes_ref[b], expand_ref[...],
                                  preferred_element_type=jnp.float32)

    # ---- 2) depthwise 3x3 / stride-2 conv: 9 lane-dense VPU taps per row ----
    wvec = convw_ref[...].astype(jnp.float32)              # (3, 3, 1, C_out)
    bias = convb_ref[...].astype(jnp.float32)              # (1, C_out)

    for b in range(bt):
        def row_body(i, carry, b=b):
            # (w_out, C_out) accumulator stays in vregs across all 9 taps.
            acc = jnp.zeros((w_out, c_out), jnp.float32)
            for kh in range(3):
                dr = kh // 2
                for kw in range(3):
                    dc = kw // 2
                    p = 2 * (kh % 2) + (kw % 2)            # parity plane id
                    start = (p * hh + i + dr) * wh + dc    # flattened plane row
                    tap = xrep_ref[b, pl.ds(start, w_out), :]
                    acc = acc + tap * wvec[kh, kw]         # (1, C_out) broadcast
            conv_out_ref[b, i] = (acc + bias).astype(conv_out_ref.dtype)
            return carry
        jax.lax.fori_loop(0, h_out, row_body, 0)

    # ---- 3) cls-token Linear (MXU) ----
    fcw = fcw_ref[...]
    fcb = fcb_ref[...].astype(jnp.float32)
    for b in range(bt):
        y = jnp.dot(cls_ref[b], fcw, preferred_element_type=jnp.float32) + fcb
        cls_out_ref[b] = y.astype(cls_out_ref.dtype)


def _pick_bt(batch, bytes_per_batch, budget_bytes, min_steps):
    best = 1
    for bt in range(1, batch + 1):
        if batch % bt:
            continue
        if bt * bytes_per_batch <= budget_bytes and (batch // bt) >= min(min_steps, batch):
            best = bt
    return best


def pooling_forward(x, cls_token, conv_w, conv_b, fc_w, fc_b, *, out_layout="NCHW"):
    """Equivalent of Pooling.forward(x, cls_token).

    x         : (B, C_in, H, W)   NCHW (odd H/W supported)
    cls_token : (B, T, C_in)
    conv_w    : (C_out, 1, 3, 3)  PyTorch grouped-conv weight (groups = C_in)
    conv_b    : (C_out,)
    fc_w      : (C_out, C_in)     PyTorch Linear weight
    fc_b      : (C_out,)
    returns   : conv output in `out_layout` ("NCHW" | "NHWC" | "tokens"), and (B, T, C_out)
    """
    B, c_in, H, W = x.shape
    c_out = conv_w.shape[0]
    T = cls_token.shape[1]
    assert c_out % c_in == 0, "groups=in_features requires out_features % in_features == 0"
    m = c_out // c_in

    h_out = (H - 1) // 2 + 1
    w_out = (W - 1) // 2 + 1
    hh, wh = h_out + 1, w_out + 1
    n_rows = 4 * hh * wh

    # ---- parity planes at C_in width: one pad + one permute (no repeat) ----
    pad_b = 1 + (H % 2)            # keep padded extent even; the extra row is never read
    pad_r = 1 + (W % 2)
    x_pad = jnp.pad(x, ((0, 0), (0, 0), (1, pad_b), (1, pad_r)))
    planes = (x_pad.reshape(B, c_in, hh, 2, wh, 2)
                   .transpose(0, 3, 5, 2, 4, 1)            # (B, pr, pc, ii, jj, C_in)
                   .reshape(B, n_rows, c_in))

    # one-hot replication matrix: out channel o reads input channel o // m
    expand = (jnp.arange(c_out)[None, :] // m == jnp.arange(c_in)[:, None]).astype(x.dtype)

    convw_k = jnp.transpose(conv_w.reshape(c_out, 3, 3), (1, 2, 0)).reshape(3, 3, 1, c_out)
    convb_k = conv_b.reshape(1, c_out)
    fcw_k = fc_w.T
    fcb_k = fc_b.reshape(1, c_out)

    # ---- batch tile sized against a conservative VMEM budget (fits v5e/v6e/v7x defaults) ----
    isz = x.dtype.itemsize
    per_batch = (2 * n_rows * c_in * isz                   # double-buffered planes block
                 + n_rows * c_out * 4                      # f32 expansion scratch
                 + 2 * h_out * w_out * c_out * isz         # double-buffered output block
                 + 2 * T * (c_in + c_out) * isz)
    bt = _pick_bt(B, per_batch, budget_bytes=12 * 1024 * 1024, min_steps=4)
    grid = (B // bt,)

    conv_out, cls_out = pl.pallas_call(
        _pooling_kernel,
        grid=grid,
        in_specs=[
            pl.BlockSpec((bt, n_rows, c_in), lambda b: (b, 0, 0)),
            pl.BlockSpec((c_in, c_out), lambda b: (0, 0)),
            pl.BlockSpec((3, 3, 1, c_out), lambda b: (0, 0, 0, 0)),
            pl.BlockSpec((1, c_out), lambda b: (0, 0)),
            pl.BlockSpec((bt, T, c_in), lambda b: (b, 0, 0)),
            pl.BlockSpec((c_in, c_out), lambda b: (0, 0)),
            pl.BlockSpec((1, c_out), lambda b: (0, 0)),
        ],
        out_specs=[
            pl.BlockSpec((bt, h_out, w_out, c_out), lambda b: (b, 0, 0, 0)),
            pl.BlockSpec((bt, T, c_out), lambda b: (b, 0, 0)),
        ],
        out_shape=[
            jax.ShapeDtypeStruct((B, h_out, w_out, c_out), x.dtype),
            jax.ShapeDtypeStruct((B, T, c_out), cls_token.dtype),
        ],
        scratch_shapes=[pltpu.VMEM((bt, n_rows, c_out), jnp.float32)],
        compiler_params=pltpu.CompilerParams(dimension_semantics=("parallel",)),
    )(planes, expand, convw_k, convb_k, cls_token, fcw_k, fcb_k)

    if out_layout == "NHWC":
        return conv_out, cls_out
    if out_layout == "tokens":                              # free reshape; what PiT consumes
        return conv_out.reshape(B, h_out * w_out, c_out), cls_out
    return jnp.transpose(conv_out, (0, 3, 1, 2)), cls_out   # module-exact NCHW


if __name__ == "__main__":
    def reference(x, cls_token, conv_w, conv_b, fc_w, fc_b):
        c_in = x.shape[1]
        c_out = conv_w.shape[0]
        conv = jax.lax.conv_general_dilated(
            x, conv_w, window_strides=(2, 2), padding=((1, 1), (1, 1)),
            dimension_numbers=("NCHW", "OIHW", "NCHW"),
            feature_group_count=c_in) + conv_b.reshape(1, c_out, 1, 1)
        cls = cls_token @ fc_w.T + fc_b
        return conv, cls

    def run_case(key, batch, c_in, c_out, height, width, tokens):
        ks = jax.random.split(key, 6)
        x = jax.random.normal(ks[0], (batch, c_in, height, width), jnp.float32)
        cls_token = jax.random.normal(ks[1], (batch, tokens, c_in), jnp.float32)
        conv_w = 0.1 * jax.random.normal(ks[2], (c_out, 1, 3, 3), jnp.float32)
        conv_b = 0.1 * jax.random.normal(ks[3], (c_out,), jnp.float32)
        fc_w = 0.1 * jax.random.normal(ks[4], (c_out, c_in), jnp.float32)
        fc_b = 0.1 * jax.random.normal(ks[5], (c_out,), jnp.float32)

        x_out, cls_out = pooling_forward(x, cls_token, conv_w, conv_b, fc_w, fc_b)
        jax.block_until_ready((x_out, cls_out))

        ref_x, ref_cls = reference(x, cls_token, conv_w, conv_b, fc_w, fc_b)
        assert x_out.shape == ref_x.shape and cls_out.shape == ref_cls.shape
        assert jnp.allclose(x_out, ref_x, atol=1e-4, rtol=1e-4)
        assert jnp.allclose(cls_out, ref_cls, atol=1e-4, rtol=1e-4)

    key = jax.random.PRNGKey(0)
    k1, k2 = jax.random.split(key)
    # Pooling(in_features=64, out_features=128): even spatial, lane-dense C_out.
    run_case(k1, batch=2, c_in=64, c_out=128, height=16, width=16, tokens=1)
    # Odd spatial size (as produced by real PiT stages, e.g. 27 -> 14).
    run_case(k2, batch=1, c_in=32, c_out=64, height=9, width=9, tokens=1)
    print("KERNEL_OK")
</pallas_src>

<mosaic_0001>
module attributes {stable_mosaic.version = 11 : i64} {
  func.func @_pooling_kernel(%arg0: i32, %arg1: memref<1x324x64xf32, #tpu.memory_space<vmem>>, %arg2: memref<64x128xf32, #tpu.memory_space<vmem>>, %arg3: memref<3x3x1x128xf32, #tpu.memory_space<vmem>>, %arg4: memref<1x128xf32, #tpu.memory_space<vmem>>, %arg5: memref<1x1x64xf32, #tpu.memory_space<vmem>>, %arg6: memref<64x128xf32, #tpu.memory_space<vmem>>, %arg7: memref<1x128xf32, #tpu.memory_space<vmem>>, %arg8: memref<1x8x8x128xf32, #tpu.memory_space<vmem>>, %arg9: memref<1x1x128xf32, #tpu.memory_space<vmem>>, %arg10: memref<1x324x128xf32, #tpu.memory_space<vmem>>) attributes {dimension_semantics = [#tpu.dimension_semantics<parallel>], iteration_bounds = array<i64: 2>, scalar_prefetch = 0 : i64, scratch_operands = 1 : i64, tpu.core_type = #tpu.core_type<tc>, window_params = [{transform_indices = @transform_0, window_bounds = array<i64: 1, 324, 64>}, {pipeline_mode = #tpu.pipeline_mode<synchronous>, transform_indices = @transform_1, window_bounds = array<i64: 64, 128>}, {pipeline_mode = #tpu.pipeline_mode<synchronous>, transform_indices = @transform_2, window_bounds = array<i64: 3, 3, 1, 128>}, {pipeline_mode = #tpu.pipeline_mode<synchronous>, transform_indices = @transform_3, window_bounds = array<i64: 1, 128>}, {transform_indices = @transform_4, window_bounds = array<i64: 1, 1, 64>}, {pipeline_mode = #tpu.pipeline_mode<synchronous>, transform_indices = @transform_5, window_bounds = array<i64: 64, 128>}, {pipeline_mode = #tpu.pipeline_mode<synchronous>, transform_indices = @transform_6, window_bounds = array<i64: 1, 128>}, {transform_indices = @transform_7, window_bounds = array<i64: 1, 8, 8, 128>}, {transform_indices = @transform_8, window_bounds = array<i64: 1, 1, 128>}]} {
    %c0 = arith.constant 0 : index
    %c0_0 = arith.constant 0 : index
    %c0_1 = arith.constant 0 : index
    %0 = vector.load %arg1[%c0, %c0_0, %c0_1] : memref<1x324x64xf32, #tpu.memory_space<vmem>>, vector<1x324x64xf32>
    %1 = vector.shape_cast %0 : vector<1x324x64xf32> to vector<324x64xf32>
    %c0_2 = arith.constant 0 : index
    %c0_3 = arith.constant 0 : index
    %2 = vector.load %arg2[%c0_2, %c0_3] : memref<64x128xf32, #tpu.memory_space<vmem>>, vector<64x128xf32>
    %cst = arith.constant dense<0.000000e+00> : vector<324x128xf32>
    %3 = tpu.matmul %1, %2, %cst {dimension_numbers = #tpu.dot_dimension_numbers<[1], [0], [0], [1], [0, 0, 1, 1], [], []>} : vector<324x64xf32>, vector<64x128xf32>, vector<324x128xf32> -> vector<324x128xf32>
    %c0_4 = arith.constant 0 : index
    %c0_5 = arith.constant 0 : index
    %c0_6 = arith.constant 0 : index
    %4 = vector.load %arg10[%c0_4, %c0_5, %c0_6] : memref<1x324x128xf32, #tpu.memory_space<vmem>>, vector<1x324x128xf32>
    %5 = vector.shape_cast %4 : vector<1x324x128xf32> to vector<324x128xf32>
    %6 = vector.shape_cast %3 : vector<324x128xf32> to vector<1x324x128xf32>
    tpu.vector_store %arg10[%c0_4, %c0_5, %c0_6], %6 {strides = array<i32>} : memref<1x324x128xf32, #tpu.memory_space<vmem>>, vector<1x324x128xf32>,
    %c0_7 = arith.constant 0 : index
    %c0_8 = arith.constant 0 : index
    %c0_9 = arith.constant 0 : index
    %c0_10 = arith.constant 0 : index
    %7 = vector.load %arg3[%c0_7, %c0_8, %c0_9, %c0_10] : memref<3x3x1x128xf32, #tpu.memory_space<vmem>>, vector<3x3x1x128xf32>
    %c0_11 = arith.constant 0 : index
    %c0_12 = arith.constant 0 : index
    %8 = vector.load %arg4[%c0_11, %c0_12] : memref<1x128xf32, #tpu.memory_space<vmem>>, vector<1x128xf32>
    %c0_i32 = arith.constant 0 : i32
    %c8_i32 = arith.constant 8 : i32
    %9 = arith.addi %c0_i32, %c8_i32 : i32
    %c1_i32 = arith.constant 1 : i32
    scf.for %arg11 = %c0_i32 to %9 step %c1_i32  : i32 {
      %cst_25 = arith.constant 0.000000e+00 : f32
      %19 = vector.broadcast %cst_25 : f32 to vector<8x128xf32>
      %c0_i32_26 = arith.constant 0 : i32
      %20 = arith.addi %c0_i32_26, %arg11 : i32
      %c0_i32_27 = arith.constant 0 : i32
      %21 = arith.addi %20, %c0_i32_27 : i32
      %c9_i32 = arith.constant 9 : i32
      %22 = arith.muli %21, %c9_i32 : i32
      %c0_i32_28 = arith.constant 0 : i32
      %23 = arith.addi %22, %c0_i32_28 : i32
      %c0_29 = arith.constant 0 : index
      %24 = arith.index_cast %23 : i32 to index
      %c0_30 = arith.constant 0 : index
      %25 = vector.load %arg10[%c0_29, %24, %c0_30] : memref<1x324x128xf32, #tpu.memory_space<vmem>>, vector<1x8x128xf32>
      %26 = vector.shape_cast %25 : vector<1x8x128xf32> to vector<8x128xf32>
      %27 = vector.extract_strided_slice %7 {offsets = [0, 0, 0, 0], sizes = [1, 1, 1, 128], strides = [1, 1, 1, 1]} : vector<3x3x1x128xf32> to vector<1x1x1x128xf32>
      %28 = vector.shape_cast %27 : vector<1x1x1x128xf32> to vector<1x128xf32>
      %29 = vector.broadcast %28 : vector<1x128xf32> to vector<8x128xf32>
      %30 = arith.mulf %26, %29 : vector<8x128xf32>
      %31 = arith.addf %19, %30 : vector<8x128xf32>
      %c9_i32_31 = arith.constant 9 : i32
      %32 = arith.addi %c9_i32_31, %arg11 : i32
      %c0_i32_32 = arith.constant 0 : i32
      %33 = arith.addi %32, %c0_i32_32 : i32
      %c9_i32_33 = arith.constant 9 : i32
      %34 = arith.muli %33, %c9_i32_33 : i32
      %c0_i32_34 = arith.constant 0 : i32
      %35 = arith.addi %34, %c0_i32_34 : i32
      %c0_35 = arith.constant 0 : index
      %36 = arith.index_cast %35 : i32 to index
      %c0_36 = arith.constant 0 : index
      %37 = vector.load %arg10[%c0_35, %36, %c0_36] : memref<1x324x128xf32, #tpu.memory_space<vmem>>, vector<1x8x128xf32>
      %38 = vector.shape_cast %37 : vector<1x8x128xf32> to vector<8x128xf32>
      %39 = vector.extract_strided_slice %7 {offsets = [0, 1, 0, 0], sizes = [1, 1, 1, 128], strides = [1, 1, 1, 1]} : vector<3x3x1x128xf32> to vector<1x1x1x128xf32>
      %40 = vector.shape_cast %39 : vector<1x1x1x128xf32> to vector<1x128xf32>
      %41 = vector.broadcast %40 : vector<1x128xf32> to vector<8x128xf32>
      %42 = arith.mulf %38, %41 : vector<8x128xf32>
      %43 = arith.addf %31, %42 : vector<8x128xf32>
      %c0_i32_37 = arith.constant 0 : i32
      %44 = arith.addi %c0_i32_37, %arg11 : i32
      %c0_i32_38 = arith.constant 0 : i32
      %45 = arith.addi %44, %c0_i32_38 : i32
      %c9_i32_39 = arith.constant 9 : i32
      %46 = arith.muli %45, %c9_i32_39 : i32
      %c1_i32_40 = arith.constant 1 : i32
      %47 = arith.addi %46, %c1_i32_40 : i32
      %c0_41 = arith.constant 0 : index
      %48 = arith.index_cast %47 : i32 to index
      %c0_42 = arith.constant 0 : index
      %49 = vector.load %arg10[%c0_41, %48, %c0_42] : memref<1x324x128xf32, #tpu.memory_space<vmem>>, vector<1x8x128xf32>
      %50 = vector.shape_cast %49 : vector<1x8x128xf32> to vector<8x128xf32>
      %51 = vector.extract_strided_slice %7 {offsets = [0, 2, 0, 0], sizes = [1, 1, 1, 128], strides = [1, 1, 1, 1]} : vector<3x3x1x128xf32> to vector<1x1x1x128xf32>
      %52 = vector.shape_cast %51 : vector<1x1x1x128xf32> to vector<1x128xf32>
      %53 = vector.broadcast %52 : vector<1x128xf32> to vector<8x128xf32>
      %54 = arith.mulf %50, %53 : vector<8x128xf32>
      %55 = arith.addf %43, %54 : vector<8x128xf32>
      %c18_i32 = arith.constant 18 : i32
      %56 = arith.addi %c18_i32, %arg11 : i32
      %c0_i32_43 = arith.constant 0 : i32
      %57 = arith.addi %56, %c0_i32_43 : i32
      %c9_i32_44 = arith.constant 9 : i32
      %58 = arith.muli %57, %c9_i32_44 : i32
      %c0_i32_45 = arith.constant 0 : i32
      %59 = arith.addi %58, %c0_i32_45 : i32
      %c0_46 = arith.constant 0 : index
      %60 = arith.index_cast %59 : i32 to index
      %c0_47 = arith.constant 0 : index
      %61 = vector.load %arg10[%c0_46, %60, %c0_47] : memref<1x324x128xf32, #tpu.memory_space<vmem>>, vector<1x8x128xf32>
      %62 = vector.shape_cast %61 : vector<1x8x128xf32> to vector<8x128xf32>
      %63 = vector.extract_strided_slice %7 {offsets = [1, 0, 0, 0], sizes = [1, 1, 1, 128], strides = [1, 1, 1, 1]} : vector<3x3x1x128xf32> to vector<1x1x1x128xf32>
      %64 = vector.shape_cast %63 : vector<1x1x1x128xf32> to vector<1x128xf32>
      %65 = vector.broadcast %64 : vector<1x128xf32> to vector<8x128xf32>
      %66 = arith.mulf %62, %65 : vector<8x128xf32>
      %67 = arith.addf %55, %66 : vector<8x128xf32>
      %c27_i32 = arith.constant 27 : i32
      %68 = arith.addi %c27_i32, %arg11 : i32
      %c0_i32_48 = arith.constant 0 : i32
      %69 = arith.addi %68, %c0_i32_48 : i32
      %c9_i32_49 = arith.constant 9 : i32
      %70 = arith.muli %69, %c9_i32_49 : i32
      %c0_i32_50 = arith.constant 0 : i32
      %71 = arith.addi %70, %c0_i32_50 : i32
      %c0_51 = arith.constant 0 : index
      %72 = arith.index_cast %71 : i32 to index
      %c0_52 = arith.constant 0 : index
      %73 = vector.load %arg10[%c0_51, %72, %c0_52] : memref<1x324x128xf32, #tpu.memory_space<vmem>>, vector<1x8x128xf32>
      %74 = vector.shape_cast %73 : vector<1x8x128xf32> to vector<8x128xf32>
      %75 = vector.extract_strided_slice %7 {offsets = [1, 1, 0, 0], sizes = [1, 1, 1, 128], strides = [1, 1, 1, 1]} : vector<3x3x1x128xf32> to vector<1x1x1x128xf32>
      %76 = vector.shape_cast %75 : vector<1x1x1x128xf32> to vector<1x128xf32>
      %77 = vector.broadcast %76 : vector<1x128xf32> to vector<8x128xf32>
      %78 = arith.mulf %74, %77 : vector<8x128xf32>
      %79 = arith.addf %67, %78 : vector<8x128xf32>
      %c18_i32_53 = arith.constant 18 : i32
      %80 = arith.addi %c18_i32_53, %arg11 : i32
      %c0_i32_54 = arith.constant 0 : i32
      %81 = arith.addi %80, %c0_i32_54 : i32
      %c9_i32_55 = arith.constant 9 : i32
      %82 = arith.muli %81, %c9_i32_55 : i32
      %c1_i32_56 = arith.constant 1 : i32
      %83 = arith.addi %82, %c1_i32_56 : i32
      %c0_57 = arith.constant 0 : index
      %84 = arith.index_cast %83 : i32 to index
      %c0_58 = arith.constant 0 : index
      %85 = vector.load %arg10[%c0_57, %84, %c0_58] : memref<1x324x128xf32, #tpu.memory_space<vmem>>, vector<1x8x128xf32>
      %86 = vector.shape_cast %85 : vector<1x8x128xf32> to vector<8x128xf32>
      %87 = vector.extract_strided_slice %7 {offsets = [1, 2, 0, 0], sizes = [1, 1, 1, 128], strides = [1, 1, 1, 1]} : vector<3x3x1x128xf32> to vector<1x1x1x128xf32>
      %88 = vector.shape_cast %87 : vector<1x1x1x128xf32> to vector<1x128xf32>
      %89 = vector.broadcast %88 : vector<1x128xf32> to vector<8x128xf32>
      %90 = arith.mulf %86, %89 : vector<8x128xf32>
      %91 = arith.addf %79, %90 : vector<8x128xf32>
      %c0_i32_59 = arith.constant 0 : i32
      %92 = arith.addi %c0_i32_59, %arg11 : i32
      %c1_i32_60 = arith.constant 1 : i32
      %93 = arith.addi %92, %c1_i32_60 : i32
      %c9_i32_61 = arith.constant 9 : i32
      %94 = arith.muli %93, %c9_i32_61 : i32
      %c0_i32_62 = arith.constant 0 : i32
      %95 = arith.addi %94, %c0_i32_62 : i32
      %c0_63 = arith.constant 0 : index
      %96 = arith.index_cast %95 : i32 to index
      %c0_64 = arith.constant 0 : index
      %97 = vector.load %arg10[%c0_63, %96, %c0_64] : memref<1x324x128xf32, #tpu.memory_space<vmem>>, vector<1x8x128xf32>
      %98 = vector.shape_cast %97 : vector<1x8x128xf32> to vector<8x128xf32>
      %99 = vector.extract_strided_slice %7 {offsets = [2, 0, 0, 0], sizes = [1, 1, 1, 128], strides = [1, 1, 1, 1]} : vector<3x3x1x128xf32> to vector<1x1x1x128xf32>
      %100 = vector.shape_cast %99 : vector<1x1x1x128xf32> to vector<1x128xf32>
      %101 = vector.broadcast %100 : vector<1x128xf32> to vector<8x128xf32>
      %102 = arith.mulf %98, %101 : vector<8x128xf32>
      %103 = arith.addf %91, %102 : vector<8x128xf32>
      %c9_i32_65 = arith.constant 9 : i32
      %104 = arith.addi %c9_i32_65, %arg11 : i32
      %c1_i32_66 = arith.constant 1 : i32
      %105 = arith.addi %104, %c1_i32_66 : i32
      %c9_i32_67 = arith.constant 9 : i32
      %106 = arith.muli %105, %c9_i32_67 : i32
      %c0_i32_68 = arith.constant 0 : i32
      %107 = arith.addi %106, %c0_i32_68 : i32
      %c0_69 = arith.constant 0 : index
      %108 = arith.index_cast %107 : i32 to index
      %c0_70 = arith.constant 0 : index
      %109 = vector.load %arg10[%c0_69, %108, %c0_70] : memref<1x324x128xf32, #tpu.memory_space<vmem>>, vector<1x8x128xf32>
      %110 = vector.shape_cast %109 : vector<1x8x128xf32> to vector<8x128xf32>
      %111 = vector.extract_strided_slice %7 {offsets = [2, 1, 0, 0], sizes = [1, 1, 1, 128], strides = [1, 1, 1, 1]} : vector<3x3x1x128xf32> to vector<1x1x1x128xf32>
      %112 = vector.shape_cast %111 : vector<1x1x1x128xf32> to vector<1x128xf32>
      %113 = vector.broadcast %112 : vector<1x128xf32> to vector<8x128xf32>
      %114 = arith.mulf %110, %113 : vector<8x128xf32>
      %115 = arith.addf %103, %114 : vector<8x128xf32>
      %c0_i32_71 = arith.constant 0 : i32
      %116 = arith.addi %c0_i32_71, %arg11 : i32
      %c1_i32_72 = arith.constant 1 : i32
      %117 = arith.addi %116, %c1_i32_72 : i32
      %c9_i32_73 = arith.constant 9 : i32
      %118 = arith.muli %117, %c9_i32_73 : i32
      %c1_i32_74 = arith.constant 1 : i32
      %119 = arith.addi %118, %c1_i32_74 : i32
      %c0_75 = arith.constant 0 : index
      %120 = arith.index_cast %119 : i32 to index
      %c0_76 = arith.constant 0 : index
      %121 = vector.load %arg10[%c0_75, %120, %c0_76] : memref<1x324x128xf32, #tpu.memory_space<vmem>>, vector<1x8x128xf32>
      %122 = vector.shape_cast %121 : vector<1x8x128xf32> to vector<8x128xf32>
      %123 = vector.extract_strided_slice %7 {offsets = [2, 2, 0, 0], sizes = [1, 1, 1, 128], strides = [1, 1, 1, 1]} : vector<3x3x1x128xf32> to vector<1x1x1x128xf32>
      %124 = vector.shape_cast %123 : vector<1x1x1x128xf32> to vector<1x128xf32>
      %125 = vector.broadcast %124 : vector<1x128xf32> to vector<8x128xf32>
      %126 = arith.mulf %122, %125 : vector<8x128xf32>
      %127 = arith.addf %115, %126 : vector<8x128xf32>
      %128 = vector.broadcast %8 : vector<1x128xf32> to vector<8x128xf32>
      %129 = arith.addf %127, %128 : vector<8x128xf32>
      %c0_77 = arith.constant 0 : index
      %130 = arith.index_cast %arg11 : i32 to index
      %c0_78 = arith.constant 0 : index
      %c0_79 = arith.constant 0 : index
      %131 = vector.load %arg8[%c0_77, %130, %c0_78, %c0_79] : memref<1x8x8x128xf32, #tpu.memory_space<vmem>>, vector<1x1x8x128xf32>
      %132 = vector.shape_cast %131 : vector<1x1x8x128xf32> to vector<8x128xf32>
      %133 = vector.shape_cast %129 : vector<8x128xf32> to vector<1x1x8x128xf32>
      tpu.vector_store %arg8[%c0_77, %130, %c0_78, %c0_79], %133 {strides = array<i32>} : memref<1x8x8x128xf32, #tpu.memory_space<vmem>>, vector<1x1x8x128xf32>,
    }
    %c8_i32_13 = arith.constant 8 : i32
    %c0_14 = arith.constant 0 : index
    %c0_15 = arith.constant 0 : index
    %10 = vector.load %arg6[%c0_14, %c0_15] : memref<64x128xf32, #tpu.memory_space<vmem>>, vector<64x128xf32>
    %c0_16 = arith.constant 0 : index
    %c0_17 = arith.constant 0 : index
    %11 = vector.load %arg7[%c0_16, %c0_17] : memref<1x128xf32, #tpu.memory_space<vmem>>, vector<1x128xf32>
    %c0_18 = arith.constant 0 : index
    %c0_19 = arith.constant 0 : index
    %c0_20 = arith.constant 0 : index
    %12 = vector.load %arg5[%c0_18, %c0_19, %c0_20] : memref<1x1x64xf32, #tpu.memory_space<vmem>>, vector<1x1x64xf32>
    %13 = vector.shape_cast %12 : vector<1x1x64xf32> to vector<1x64xf32>
    %cst_21 = arith.constant dense<0.000000e+00> : vector<1x128xf32>
    %14 = tpu.matmul %13, %10, %cst_21 {dimension_numbers = #tpu.dot_dimension_numbers<[1], [0], [0], [1], [0, 0, 1, 1], [], []>} : vector<1x64xf32>, vector<64x128xf32>, vector<1x128xf32> -> vector<1x128xf32>
    %15 = arith.addf %14, %11 : vector<1x128xf32>
    %c0_22 = arith.constant 0 : index
    %c0_23 = arith.constant 0 : index
    %c0_24 = arith.constant 0 : index
    %16 = vector.load %arg9[%c0_22, %c0_23, %c0_24] : memref<1x1x128xf32, #tpu.memory_space<vmem>>, vector<1x1x128xf32>
    %17 = vector.shape_cast %16 : vector<1x1x128xf32> to vector<1x128xf32>
    %18 = vector.shape_cast %15 : vector<1x128xf32> to vector<1x1x128xf32>
    tpu.vector_store %arg9[%c0_22, %c0_23, %c0_24], %18 {strides = array<i32>} : memref<1x1x128xf32, #tpu.memory_space<vmem>>, vector<1x1x128xf32>,
    return
  }
  func.func @transform_0(%arg0: i32) -> (i32, i32, i32) {
    %c0_i32 = arith.constant 0 : i32
    %c0_i32_0 = arith.constant 0 : i32
    %c0_i32_1 = arith.constant 0 : i32
    return %arg0, %c0_i32, %c0_i32_0 : i32, i32, i32
  }
  func.func @transform_1(%arg0: i32) -> (i32, i32) {
    %c0_i32 = arith.constant 0 : i32
    %c0_i32_0 = arith.constant 0 : i32
    %c0_i32_1 = arith.constant 0 : i32
    return %c0_i32, %c0_i32_0 : i32, i32
  }
  func.func @transform_2(%arg0: i32) -> (i32, i32, i32, i32) {
    %c0_i32 = arith.constant 0 : i32
    %c0_i32_0 = arith.constant 0 : i32
    %c0_i32_1 = arith.constant 0 : i32
    %c0_i32_2 = arith.constant 0 : i32
    %c0_i32_3 = arith.constant 0 : i32
    return %c0_i32, %c0_i32_0, %c0_i32_1, %c0_i32_2 : i32, i32, i32, i32
  }
  func.func @transform_3(%arg0: i32) -> (i32, i32) {
    %c0_i32 = arith.constant 0 : i32
    %c0_i32_0 = arith.constant 0 : i32
    %c0_i32_1 = arith.constant 0 : i32
    return %c0_i32, %c0_i32_0 : i32, i32
  }
  func.func @transform_4(%arg0: i32) -> (i32, i32, i32) {
    %c0_i32 = arith.constant 0 : i32
    %c0_i32_0 = arith.constant 0 : i32
    %c0_i32_1 = arith.constant 0 : i32
    return %arg0, %c0_i32, %c0_i32_0 : i32, i32, i32
  }
  func.func @transform_5(%arg0: i32) -> (i32, i32) {
    %c0_i32 = arith.constant 0 : i32
    %c0_i32_0 = arith.constant 0 : i32
    %c0_i32_1 = arith.constant 0 : i32
    return %c0_i32, %c0_i32_0 : i32, i32
  }
  func.func @transform_6(%arg0: i32) -> (i32, i32) {
    %c0_i32 = arith.constant 0 : i32
    %c0_i32_0 = arith.constant 0 : i32
    %c0_i32_1 = arith.constant 0 : i32
    return %c0_i32, %c0_i32_0 : i32, i32
  }
  func.func @transform_7(%arg0: i32) -> (i32, i32, i32, i32) {
    %c0_i32 = arith.constant 0 : i32
    %c0_i32_0 = arith.constant 0 : i32
    %c0_i32_1 = arith.constant 0 : i32
    %c0_i32_2 = arith.constant 0 : i32
    return %arg0, %c0_i32, %c0_i32_0, %c0_i32_1 : i32, i32, i32, i32
  }
  func.func @transform_8(%arg0: i32) -> (i32, i32, i32) {
    %c0_i32 = arith.constant 0 : i32
    %c0_i32_0 = arith.constant 0 : i32
    %c0_i32_1 = arith.constant 0 : i32
    return %arg0, %c0_i32, %c0_i32_0 : i32, i32, i32
  }
}

</mosaic_0001>

<bundles_post_ra>
// kernel: tpu_custom_call.1
= control target key start
LH: loop header
LB: loop body
LE: loop exit
PB: predicated region body
PF: predicated region fallthrough
CT: control target
= control target key end

     0   :  { %s2186_s0 = inlined_call_operand.vmem [shape: f32[2,324,64], index: 0, kind: input, shape index: {}]   ;;  %s2187_s1 = inlined_call_operand.vmem [shape: f32[64,128], index: 1, kind: input, shape index: {}]   ;;  %s2188_s2 = inlined_call_operand.vmem [shape: f32[3,3,1,128], index: 2, kind: input, shape index: {}]   ;;  %s2189_s3 = inlined_call_operand.vmem [shape: f32[1,128], index: 3, kind: input, shape index: {}]   ;;  %s2190_s4 = inlined_call_operand.vmem [shape: f32[2,1,64], index: 4, kind: input, shape index: {}]   ;;  %s2191_s5 = inlined_call_operand.vmem [shape: f32[64,128], index: 5, kind: input, shape index: {}]   ;;  %s2192_s6 = inlined_call_operand.vmem [shape: f32[1,128], index: 6, kind: input, shape index: {}]   ;;  %s2193_s7 = inlined_call_operand.hbm [shape: f32[2,8,8,128], index: 7, kind: output, shape index: {0}]   ;;  %s2194_s8 = inlined_call_operand.hbm [shape: f32[2,1,128], index: 8, kind: output, shape index: {1}]  }
   0x1   :  { %2195 = sst [smem:[#allocation9_spill]] %s2186_s0 }
   0x2   :  { %2196 = sst [smem:[#allocation10_spill]] %s2187_s1 }
   0x3   :  { %14 = vsyncpa [#allocation4], 0 }
   0x4   :  { %16 = vsyncpa [#allocation4 + $0x1], 0 }
   0x5   :  { %17 = vsyncpa [#allocation6], 0 }
   0x6   :  { %19 = vsyncpa [#allocation6 + $0x1], 0  ;;  %s1725_s27 = smov 0   ;;  %s1727_s28 = smov 0  }
   0x7   :  { %s1729_s29 = smov 0   ;;  %s1731_s30 = smov 0  }
   0x8 LB: > { %s1746_s9 = sadd.s32 4294967295, %s1667_s30   ;;  %s1189_s10 = sadd.s32 4294967294, %s1667_s30   ;;  %s1667_s30 = sphi %s1731_s30, %s2207_s30   ;;  %s1663_s29 = sphi %s1729_s29, %s2206_s29   ;;  %s1659_s28 = sphi %s1727_s28, %s2205_s28   ;;  %s1655_s27 = sphi %s1725_s27, %s2204_s27  }
   0x9   : > { %s1750_s11 = sadd.s32 1, %s1667_s30   ;;  %s189_s12 = sadd.s32 1, %s1663_s29 }
   0xa   : > { %s186_s13 = ssub.s32 %s1667_s30, %s1750_s11  ;;  %p199_p0 = scmp.ne.s32.totalorder %s1663_s29, %s1659_s28 }
   0xb   : > { %p187_p1 = scmp.eq.s32.totalorder %s186_s13, 0  ;;  %p200_p2 = scmp.eq.s32.totalorder %s1746_s9, 1 }
   0xc   : > { %p205_p3 = scmp.ne.s32.totalorder %s1659_s28, %s1655_s27  ;;  %p206_p4 = scmp.eq.s32.totalorder %s1189_s10, 1 }
   0xd   : > { %s1761_s14 = scalar_select %p187_p1, %s1663_s29, %s189_s12  }
   0xe   : > { %p1763_p5 = por %p200_p2, %p199_p0  ;;  %p1767_p6 = por %p206_p4, %p205_p3 }
   0xf   : > { %p1192_p7 = scmp.ge.s32.totalorder %s1667_s30, 1  ;;  %p279_p8 = scmp.lt.s32.totalorder %s1667_s30, 3 }
  0x11   : > { %p280_p9 = pnand %p1192_p7, %p279_p8 }
  0x12   : > { %s1774_s17 = sand.u32 (!%p280_p9), 1, %s1659_s28   ;;  %s2199_s1 = sld [smem:[#allocation10_spill]] (!%p280_p9)  ;;  %v1673_v3 = vmov (!%p280_p9), 0.0|0.0   ;;  %vm1674_vm0 = vmmov (!%p280_p9), 0   ;;  %v1675_v6 = vmov (!%p280_p9), 0.0   ;;  %vm377_vm1 = vcmask (!%p280_p9), 523264  }
  0x13   : > { %283 = sbr.rel (%p280_p9) target bundleno = 586 (0x24a), region = 48  ;;  %s1193_s24 = sshll.u32 (!%p280_p9), %s1774_s17, 6  ;;  %1479 = vmatprep.subr.bf16.mxu0 (!%p280_p9), %v1673_v3  ;;  %1503 = vmatprep.subr.bf16.mxu1 (!%p280_p9), %v1673_v3  ;;  %v1990_v55 = vld [vmem:[%s2188_s2] ss:$0 sm:$0xff] (!%p280_p9)  ;;  %v1995_v56 = vld [vmem:[%s2188_s2 + $0x1] ss:$0 sm:$0xff] (!%p280_p9) }
  0x14   : > { %1337 = vmatprep.mubr.msk.f32.mxu0 (!%p280_p9), %vm1674_vm0, %v1675_v6  ;;  %p320_p10 = scmp.lt.s32.totalorder (!%p280_p9), %s1746_s9, 1  ;;  %1400 = vmatprep.mubr.msk.f32.mxu1 (!%p280_p9), %vm1674_vm0, %v1675_v6  ;;  %s2200_s0 = sld [smem:[#allocation9_spill]] (!%p280_p9)  ;;  %v2000_v57 = vld [vmem:[%s2188_s2 + $0x2] ss:$0 sm:$0xff] (!%p280_p9)  ;;  %v2005_v58 = vld [vmem:[%s2188_s2 + $0x3] ss:$0 sm:$0xff] (!%p280_p9) }
  0x15   : > { %v2010_v59 = vld [vmem:[%s2188_s2 + $0x4] ss:$0 sm:$0xff] (!%p280_p9)  ;;  %v2015_v60 = vld [vmem:[%s2188_s2 + $0x5] ss:$0 sm:$0xff] (!%p280_p9)  ;;  %v2020_v61 = vld [vmem:[%s2188_s2 + $0x6] ss:$0 sm:$0xff] (!%p280_p9) }
  0x16   : > { %v2025_v62 = vld [vmem:[%s2188_s2 + $0x7] ss:$0 sm:$0xff] (!%p280_p9)  ;;  %v2030_v63 = vld [vmem:[%s2188_s2 + $0x8] ss:$0 sm:$0xff] (!%p280_p9)  ;;  %s2039_s21 = scalar_lea.vmem (!%p280_p9), [#allocation3], %s1193_s24  ;;  %s2042_s25 = smov (!%p280_p9), 0  }
  0x18   : > { %v369_v0 = vld [vmem:[%s2199_s1] sm:$0xff] (!%p280_p9)  ;;  %v370_v1 = vld [vmem:[%s2199_s1 + $0x8] sm:$0xff] (!%p280_p9)  ;;  %v371_v2 = vld [vmem:[%s2199_s1 + $0x10] sm:$0xff] (!%p280_p9) }
  0x19   : > { %v1480_v4 = vpack.c.bf16 (!%p280_p9), %v370_v1, %v369_v0  ;;  %v372_v5 = vld [vmem:[%s2199_s1 + $0x18] sm:$0xff] (!%p280_p9)  ;;  %v373_v8 = vld [vmem:[%s2199_s1 + $0x20] sm:$0xff] (!%p280_p9)  ;;  %v374_v9 = vld [vmem:[%s2199_s1 + $0x28] sm:$0xff] (!%p280_p9) }
  0x1a   : > { %v1483_v7 = vpack.c.bf16 %v372_v5, %v371_v2  ;;  %s1805_s19 = scalar_select %p320_p10, %s1746_s9, 1  ;;  %v1486_v10 = vpack.c.bf16 %v374_v9, %v373_v8  ;;  %v375_v11 = vld [vmem:[%s2199_s1 + $0x30] sm:$0xff]  ;;  %v376_v12 = vld [vmem:[%s2199_s1 + $0x38] sm:$0xff]  ;;  %v2035_v0 = vld [vmem:[%s2189_s3] ss:$0 sm:$0xff] }
  0x1b   : > { %1481 = vmatpush3.bf16.msra.mxu0 %v1480_v4  ;;  %1507 = vmatpush3.bf16.msra.mxu1 %v1480_v4  ;;  %v1489_v13 = vpack.c.bf16 %v376_v12, %v375_v11 }
  0x1c   : > { %1482 = vmatprep.subr.bf16.mxu0 %v1673_v3  ;;  %1504 = vmatprep.subr.bf16.mxu1 %v1673_v3  ;;  %s1511_s12 = smul.u32 328, %s1805_s19 }
  0x1e   : > { %s1825_s20 = scalar_lea.vmem %s2200_s0, %s1511_s12 }
  0x1f   : > { %1484 = vmatpush3.bf16.msra.mxu0 %v1483_v7  ;;  %1508 = vmatpush3.bf16.msra.mxu1 %v1483_v7  ;;  %v328_v14 = vld [vmem:[%s1825_s20] sm:$0xff]  ;;  %v349_v15 = vld [vmem:[%s1825_s20 + $0xa8] sm:$0xff]  ;;  %v350_v17 = vld [vmem:[%s1825_s20 + $0xb0] sm:$0xff] }
  0x20   : > { %1485 = vmatprep.subr.bf16.mxu0 %v1673_v3  ;;  %1505 = vmatprep.subr.bf16.mxu1 %v1673_v3  ;;  %v329_v16 = vld [vmem:[%s1825_s20 + $0x8] sm:$0xff]  ;;  %v330_v18 = vld [vmem:[%s1825_s20 + $0x10] sm:$0xff]  ;;  %v351_v19 = vld [vmem:[%s1825_s20 + $0xb8] sm:$0xff] }
  0x21   : > { %v331_v20 = vld [vmem:[%s1825_s20 + $0x18] sm:$0xff]  ;;  %v352_v21 = vld [vmem:[%s1825_s20 + $0xc0] sm:$0xff]  ;;  %v353_v23 = vld [vmem:[%s1825_s20 + $0xc8] sm:$0xff] }
  0x22   : > { %v332_v22 = vld [vmem:[%s1825_s20 + $0x20] sm:$0xff]  ;;  %v333_v24 = vld [vmem:[%s1825_s20 + $0x28] sm:$0xff]  ;;  %v354_v25 = vld [vmem:[%s1825_s20 + $0xd0] sm:$0xff] }
  0x23   : > { %1487 = vmatpush3.bf16.msra.mxu0 %v1486_v10  ;;  %1509 = vmatpush3.bf16.msra.mxu1 %v1486_v10  ;;  %v334_v26 = vld [vmem:[%s1825_s20 + $0x30] sm:$0xff]  ;;  %v355_v27 = vld [vmem:[%s1825_s20 + $0xd8] sm:$0xff]  ;;  %v356_v29 = vld [vmem:[%s1825_s20 + $0xe0] sm:$0xff] }
  0x24   : > { %1488 = vmatprep.subr.bf16.mxu0 %v1673_v3  ;;  %1506 = vmatprep.subr.bf16.mxu1 %v1673_v3  ;;  %v335_v28 = vld [vmem:[%s1825_s20 + $0x38] sm:$0xff]  ;;  %v336_v30 = vld [vmem:[%s1825_s20 + $0x40] sm:$0xff]  ;;  %v357_v31 = vld [vmem:[%s1825_s20 + $0xe8] sm:$0xff] }
  0x25   : > { %v337_v32 = vld [vmem:[%s1825_s20 + $0x48] sm:$0xff]  ;;  %v358_v33 = vld [vmem:[%s1825_s20 + $0xf0] sm:$0xff]  ;;  %v359_v35 = vld [vmem:[%s1825_s20 + $0xf8] sm:$0xff] }
  0x26   : > { %v338_v34 = vld [vmem:[%s1825_s20 + $0x50] sm:$0xff]  ;;  %v339_v36 = vld [vmem:[%s1825_s20 + $0x58] sm:$0xff]  ;;  %v360_v37 = vld [vmem:[%s1825_s20 + $0x100] sm:$0xff] }
  0x27   : > { %1490 = vmatpush3.bf16.msra.mxu0 %v1489_v13  ;;  %1510 = vmatpush3.bf16.msra.mxu1 %v1489_v13  ;;  %v340_v38 = vld [vmem:[%s1825_s20 + $0x60] sm:$0xff]  ;;  %v361_v39 = vld [vmem:[%s1825_s20 + $0x108] sm:$0xff]  ;;  %v362_v41 = vld [vmem:[%s1825_s20 + $0x110] sm:$0xff] }
  0x28   : > { %v341_v40 = vld [vmem:[%s1825_s20 + $0x68] sm:$0xff]  ;;  %v342_v42 = vld [vmem:[%s1825_s20 + $0x70] sm:$0xff]  ;;  %v363_v43 = vld [vmem:[%s1825_s20 + $0x118] sm:$0xff] }
  0x29   : > { %v343_v44 = vld [vmem:[%s1825_s20 + $0x78] sm:$0xff]  ;;  %v364_v45 = vld [vmem:[%s1825_s20 + $0x120] sm:$0xff]  ;;  %v365_v47 = vld [vmem:[%s1825_s20 + $0x128] sm:$0xff] }
  0x2a   : > { %1338 = vmatmul.mubr.msk.f32.vlgmr.msra.gmra.mrb[0].mxu0 %vm377_vm1, %v328_v14  ;;  %1401 = vmatmul.mubr.msk.f32.vlgmr.msra.gmra.mrb[0].mxu1 %vm377_vm1, %v349_v15  ;;  %v344_v46 = vld [vmem:[%s1825_s20 + $0x80] sm:$0xff]  ;;  %v345_v48 = vld [vmem:[%s1825_s20 + $0x88] sm:$0xff]  ;;  %v366_v49 = vld [vmem:[%s1825_s20 + $0x130] sm:$0xff] }
  0x2b   : > { %1340 = vmatprep.mubr.msk.f32.mxu0 %vm1674_vm0, %v1675_v6  ;;  %1403 = vmatprep.mubr.msk.f32.mxu1 %vm1674_vm0, %v1675_v6  ;;  %v346_v50 = vld [vmem:[%s1825_s20 + $0x90] sm:$0xff]  ;;  %v367_v51 = vld [vmem:[%s1825_s20 + $0x138] sm:$0xff]  ;;  %v368_v53 = vld [vmem:[%s1825_s20 + $0x140] sm:$0xf] }
  0x2c   : > { %v347_v52 = vld [vmem:[%s1825_s20 + $0x98] sm:$0xff]  ;;  %v348_v54 = vld [vmem:[%s1825_s20 + $0xa0] sm:$0xff] }
  0x2e   : > { %1341 = vmatmul.mubr.msk.f32.gmra.mrb[2].mxu0 %vm377_vm1, %v329_v16  ;;  %1404 = vmatmul.mubr.msk.f32.gmra.mrb[2].mxu1 %vm377_vm1, %v350_v17 }
  0x2f   : > { %1343 = vmatprep.mubr.msk.f32.mxu0 %vm1674_vm0, %v1675_v6  ;;  %1406 = vmatprep.mubr.msk.f32.mxu1 %vm1674_vm0, %v1675_v6 }
  0x32   : > { %1344 = vmatmul.mubr.msk.f32.gmra.mrb[4].mxu0 %vm377_vm1, %v330_v18  ;;  %1407 = vmatmul.mubr.msk.f32.gmra.mrb[4].mxu1 %vm377_vm1, %v351_v19 }
  0x33   : > { %1346 = vmatprep.mubr.msk.f32.mxu0 %vm1674_vm0, %v1675_v6  ;;  %1409 = vmatprep.mubr.msk.f32.mxu1 %vm1674_vm0, %v1675_v6 }
  0x36   : > { %1347 = vmatmul.mubr.msk.f32.gmra.mrb[6].mxu0 %vm377_vm1, %v331_v20  ;;  %1410 = vmatmul.mubr.msk.f32.gmra.mrb[6].mxu1 %vm377_vm1, %v352_v21 }
  0x37   : > { %1349 = vmatprep.mubr.msk.f32.mxu0 %vm1674_vm0, %v1675_v6  ;;  %1412 = vmatprep.mubr.msk.f32.mxu1 %vm1674_vm0, %v1675_v6 }
  0x3a   : > { %1350 = vmatmul.mubr.msk.f32.gmra.mrb[8].mxu0 %vm377_vm1, %v332_v22  ;;  %1413 = vmatmul.mubr.msk.f32.gmra.mrb[8].mxu1 %vm377_vm1, %v353_v23 }
  0x3b   : > { %1352 = vmatprep.mubr.msk.f32.mxu0 %vm1674_vm0, %v1675_v6  ;;  %1415 = vmatprep.mubr.msk.f32.mxu1 %vm1674_vm0, %v1675_v6 }
  0x3e   : > { %1353 = vmatmul.mubr.msk.f32.gmra.mrb[10].mxu0 %vm377_vm1, %v333_v24  ;;  %1416 = vmatmul.mubr.msk.f32.gmra.mrb[10].mxu1 %vm377_vm1, %v354_v25 }
  0x3f   : > { %1355 = vmatprep.mubr.msk.f32.mxu0 %vm1674_vm0, %v1675_v6  ;;  %1418 = vmatprep.mubr.msk.f32.mxu1 %vm1674_vm0, %v1675_v6 }
  0x42   : > { %1356 = vmatmul.mubr.msk.f32.gmra.mrb[12].mxu0 %vm377_vm1, %v334_v26  ;;  %1419 = vmatmul.mubr.msk.f32.gmra.mrb[12].mxu1 %vm377_vm1, %v355_v27 }
  0x43   : > { %1358 = vmatprep.mubr.msk.f32.mxu0 %vm1674_vm0, %v1675_v6  ;;  %1421 = vmatprep.mubr.msk.f32.mxu1 %vm1674_vm0, %v1675_v6 }
  0x46   : > { %1359 = vmatmul.mubr.msk.f32.gmra.mrb[14].mxu0 %vm377_vm1, %v335_v28  ;;  %1422 = vmatmul.mubr.msk.f32.gmra.mrb[14].mxu1 %vm377_vm1, %v356_v29 }
  0x47   : > { %1361 = vmatprep.mubr.msk.f32.mxu0 %vm1674_vm0, %v1675_v6  ;;  %1424 = vmatprep.mubr.msk.f32.mxu1 %vm1674_vm0, %v1675_v6 }
  0x4a   : > { %1362 = vmatmul.mubr.msk.f32.gmra.mrb[16].mxu0 %vm377_vm1, %v336_v30  ;;  %1425 = vmatmul.mubr.msk.f32.gmra.mrb[16].mxu1 %vm377_vm1, %v357_v31 }
  0x4b   : > { %1364 = vmatprep.mubr.msk.f32.mxu0 %vm1674_vm0, %v1675_v6  ;;  %1427 = vmatprep.mubr.msk.f32.mxu1 %vm1674_vm0, %v1675_v6 }
  0x4e   : > { %1365 = vmatmul.mubr.msk.f32.gmra.mrb[18].mxu0 %vm377_vm1, %v337_v32  ;;  %1428 = vmatmul.mubr.msk.f32.gmra.mrb[18].mxu1 %vm377_vm1, %v358_v33 }
  0x4f   : > { %1367 = vmatprep.mubr.msk.f32.mxu0 %vm1674_vm0, %v1675_v6  ;;  %1430 = vmatprep.mubr.msk.f32.mxu1 %vm1674_vm0, %v1675_v6 }
  0x52   : > { %1368 = vmatmul.mubr.msk.f32.gmra.mrb[20].mxu0 %vm377_vm1, %v338_v34  ;;  %1431 = vmatmul.mubr.msk.f32.gmra.mrb[20].mxu1 %vm377_vm1, %v359_v35 }
  0x53   : > { %1370 = vmatprep.mubr.msk.f32.mxu0 %vm1674_vm0, %v1675_v6  ;;  %1433 = vmatprep.mubr.msk.f32.mxu1 %vm1674_vm0, %v1675_v6 }
  0x56   : > { %1371 = vmatmul.mubr.msk.f32.gmra.mrb[22].mxu0 %vm377_vm1, %v339_v36  ;;  %1434 = vmatmul.mubr.msk.f32.gmra.mrb[22].mxu1 %vm377_vm1, %v360_v37 }
  0x57   : > { %1373 = vmatprep.mubr.msk.f32.mxu0 %vm1674_vm0, %v1675_v6  ;;  %1436 = vmatprep.mubr.msk.f32.mxu1 %vm1674_vm0, %v1675_v6 }
  0x5a   : > { %1374 = vmatmul.mubr.msk.f32.gmra.mrb[24].mxu0 %vm377_vm1, %v340_v38  ;;  %1437 = vmatmul.mubr.msk.f32.gmra.mrb[24].mxu1 %vm377_vm1, %v361_v39 }
  0x5b   : > { %1376 = vmatprep.mubr.msk.f32.mxu0 %vm1674_vm0, %v1675_v6  ;;  %1439 = vmatprep.mubr.msk.f32.mxu1 %vm1674_vm0, %v1675_v6 }
  0x5e   : > { %1377 = vmatmul.mubr.msk.f32.gmra.mrb[26].mxu0 %vm377_vm1, %v341_v40  ;;  %1440 = vmatmul.mubr.msk.f32.gmra.mrb[26].mxu1 %vm377_vm1, %v362_v41 }
  0x5f   : > { %1379 = vmatprep.mubr.msk.f32.mxu0 %vm1674_vm0, %v1675_v6  ;;  %1442 = vmatprep.mubr.msk.f32.mxu1 %vm1674_vm0, %v1675_v6 }
  0x62   : > { %1380 = vmatmul.mubr.msk.f32.gmra.mrb[28].mxu0 %vm377_vm1, %v342_v42  ;;  %1443 = vmatmul.mubr.msk.f32.gmra.mrb[28].mxu1 %vm377_vm1, %v363_v43 }
  0x63   : > { %1382 = vmatprep.mubr.msk.f32.mxu0 %vm1674_vm0, %v1675_v6  ;;  %1445 = vmatprep.mubr.msk.f32.mxu1 %vm1674_vm0, %v1675_v6 }
  0x66   : > { %1383 = vmatmul.mubr.msk.f32.gmra.mrb[30].mxu0 %vm377_vm1, %v343_v44  ;;  %1446 = vmatmul.mubr.msk.f32.gmra.mrb[30].mxu1 %vm377_vm1, %v364_v45 }
  0x67   : > { %1385 = vmatprep.mubr.msk.f32.mxu0 %vm1674_vm0, %v1675_v6  ;;  %1448 = vmatprep.mubr.msk.f32.mxu1 %vm1674_vm0, %v1675_v6 }
  0x6a   : > { %1386 = vmatmul.mubr.msk.f32.gmra.mrb[32].mxu0 %vm377_vm1, %v344_v46  ;;  %1449 = vmatmul.mubr.msk.f32.gmra.mrb[32].mxu1 %vm377_vm1, %v365_v47 }
  0x6b   : > { %1388 = vmatprep.mubr.msk.f32.mxu0 %vm1674_vm0, %v1675_v6  ;;  %1451 = vmatprep.mubr.msk.f32.mxu1 %vm1674_vm0, %v1675_v6 }
  0x6e   : > { %1389 = vmatmul.mubr.msk.f32.gmra.mrb[34].mxu0 %vm377_vm1, %v345_v48  ;;  %1452 = vmatmul.mubr.msk.f32.gmra.mrb[34].mxu1 %vm377_vm1, %v366_v49 }
  0x6f   : > { %1391 = vmatprep.mubr.msk.f32.mxu0 %vm1674_vm0, %v1675_v6  ;;  %1454 = vmatprep.mubr.msk.f32.mxu1 %vm1674_vm0, %v1675_v6 }
  0x72   : > { %1392 = vmatmul.mubr.msk.f32.gmra.mrb[36].mxu0 %vm377_vm1, %v346_v50  ;;  %1455 = vmatmul.mubr.msk.f32.gmra.mrb[36].mxu1 %vm377_vm1, %v367_v51 }
  0x73   : > { %1394 = vmatprep.mubr.msk.f32.mxu0 %vm1674_vm0, %v1675_v6  ;;  %1457 = vmatprep.mubr.msk.f32.mxu1 %vm1674_vm0, %v1675_v6 }
  0x76   : > { %1395 = vmatmul.mubr.msk.f32.gmra.mrb[38].mxu0 %vm377_vm1, %v347_v52  ;;  %1458 = vmatmul.mubr.msk.f32.gmra.mrb[38].mxu1 %vm377_vm1, %v368_v53 }
  0x77   : > { %1397 = vmatprep.mubr.msk.f32.mxu0 %vm1674_vm0, %v1675_v6 }
  0x7a   : > { %1398 = vmatmul.mubr.msk.f32.gmra.mrb[40].mxu0 %vm377_vm1, %v348_v54 }
  0xfd   : > { %v567_v1 = vpop.f32.mrb[0].mxu0  ;;  %v672_v2 = vpop.f32.mrb[0].mxu1 }
  0xfe   : > { %771 = vst [vmem:[#allocation2] sm:$0xff] %v567_v1  ;;  %v1339_v4 = vpop.f32.mrb[1].mxu0  ;;  %792 = vst [vmem:[#allocation2 + $0xa8] sm:$0xff] %v672_v2  ;;  %v1402_v5 = vpop.f32.mrb[1].mxu1 }
 0x101   : > { %v572_v7 = vpop.f32.mrb[2].mxu0  ;;  %v677_v8 = vpop.f32.mrb[2].mxu1 }
 0x102   : > { %772 = vst [vmem:[#allocation2 + $0x8] sm:$0xff] %v572_v7  ;;  %v1342_v9 = vpop.f32.mrb[3].mxu0  ;;  %793 = vst [vmem:[#allocation2 + $0xb0] sm:$0xff] %v677_v8  ;;  %v1405_v10 = vpop.f32.mrb[3].mxu1 }
 0x105   : > { %v577_v11 = vpop.f32.mrb[4].mxu0  ;;  %v682_v12 = vpop.f32.mrb[4].mxu1 }
 0x106   : > { %773 = vst [vmem:[#allocation2 + $0x10] sm:$0xff] %v577_v11  ;;  %v1345_v13 = vpop.f32.mrb[5].mxu0  ;;  %794 = vst [vmem:[#allocation2 + $0xb8] sm:$0xff] %v682_v12  ;;  %v1408_v14 = vpop.f32.mrb[5].mxu1 }
 0x109   : > { %v582_v15 = vpop.f32.mrb[6].mxu0  ;;  %v687_v16 = vpop.f32.mrb[6].mxu1 }
 0x10a   : > { %774 = vst [vmem:[#allocation2 + $0x18] sm:$0xff] %v582_v15  ;;  %v1348_v17 = vpop.f32.mrb[7].mxu0  ;;  %795 = vst [vmem:[#allocation2 + $0xc0] sm:$0xff] %v687_v16  ;;  %v1411_v18 = vpop.f32.mrb[7].mxu1 }
 0x10d   : > { %v587_v19 = vpop.f32.mrb[8].mxu0  ;;  %v692_v20 = vpop.f32.mrb[8].mxu1 }
 0x10e   : > { %775 = vst [vmem:[#allocation2 + $0x20] sm:$0xff] %v587_v19  ;;  %v1351_v21 = vpop.f32.mrb[9].mxu0  ;;  %796 = vst [vmem:[#allocation2 + $0xc8] sm:$0xff] %v692_v20  ;;  %v1414_v22 = vpop.f32.mrb[9].mxu1 }
 0x111   : > { %v592_v23 = vpop.f32.mrb[10].mxu0  ;;  %v697_v24 = vpop.f32.mrb[10].mxu1 }
 0x112   : > { %776 = vst [vmem:[#allocation2 + $0x28] sm:$0xff] %v592_v23  ;;  %v1354_v25 = vpop.f32.mrb[11].mxu0  ;;  %797 = vst [vmem:[#allocation2 + $0xd0] sm:$0xff] %v697_v24  ;;  %v1417_v26 = vpop.f32.mrb[11].mxu1 }
 0x115   : > { %v597_v27 = vpop.f32.mrb[12].mxu0  ;;  %v702_v28 = vpop.f32.mrb[12].mxu1 }
 0x116   : > { %777 = vst [vmem:[#allocation2 + $0x30] sm:$0xff] %v597_v27  ;;  %v1357_v29 = vpop.f32.mrb[13].mxu0  ;;  %798 = vst [vmem:[#allocation2 + $0xd8] sm:$0xff] %v702_v28  ;;  %v1420_v30 = vpop.f32.mrb[13].mxu1 }
 0x119   : > { %v602_v31 = vpop.f32.mrb[14].mxu0  ;;  %v707_v32 = vpop.f32.mrb[14].mxu1 }
 0x11a   : > { %778 = vst [vmem:[#allocation2 + $0x38] sm:$0xff] %v602_v31  ;;  %v1360_v33 = vpop.f32.mrb[15].mxu0  ;;  %799 = vst [vmem:[#allocation2 + $0xe0] sm:$0xff] %v707_v32  ;;  %v1423_v34 = vpop.f32.mrb[15].mxu1 }
 0x11d   : > { %v607_v35 = vpop.f32.mrb[16].mxu0  ;;  %v712_v36 = vpop.f32.mrb[16].mxu1 }
 0x11e   : > { %779 = vst [vmem:[#allocation2 + $0x40] sm:$0xff] %v607_v35  ;;  %v1363_v37 = vpop.f32.mrb[17].mxu0  ;;  %800 = vst [vmem:[#allocation2 + $0xe8] sm:$0xff] %v712_v36  ;;  %v1426_v38 = vpop.f32.mrb[17].mxu1 }
 0x121   : > { %v612_v39 = vpop.f32.mrb[18].mxu0  ;;  %v717_v40 = vpop.f32.mrb[18].mxu1 }
 0x122   : > { %780 = vst [vmem:[#allocation2 + $0x48] sm:$0xff] %v612_v39  ;;  %v1366_v41 = vpop.f32.mrb[19].mxu0  ;;  %801 = vst [vmem:[#allocation2 + $0xf0] sm:$0xff] %v717_v40  ;;  %v1429_v42 = vpop.f32.mrb[19].mxu1 }
 0x125   : > { %v617_v43 = vpop.f32.mrb[20].mxu0  ;;  %v722_v44 = vpop.f32.mrb[20].mxu1 }
 0x126   : > { %781 = vst [vmem:[#allocation2 + $0x50] sm:$0xff] %v617_v43  ;;  %v1369_v45 = vpop.f32.mrb[21].mxu0  ;;  %802 = vst [vmem:[#allocation2 + $0xf8] sm:$0xff] %v722_v44  ;;  %v1432_v46 = vpop.f32.mrb[21].mxu1 }
 0x129   : > { %v622_v47 = vpop.f32.mrb[22].mxu0  ;;  %v727_v48 = vpop.f32.mrb[22].mxu1 }
 0x12a   : > { %782 = vst [vmem:[#allocation2 + $0x58] sm:$0xff] %v622_v47  ;;  %v1372_v49 = vpop.f32.mrb[23].mxu0  ;;  %803 = vst [vmem:[#allocation2 + $0x100] sm:$0xff] %v727_v48  ;;  %v1435_v50 = vpop.f32.mrb[23].mxu1 }
 0x12d   : > { %v627_v51 = vpop.f32.mrb[24].mxu0  ;;  %v732_v52 = vpop.f32.mrb[24].mxu1 }
 0x12e   : > { %783 = vst [vmem:[#allocation2 + $0x60] sm:$0xff] %v627_v51  ;;  %v1375_v53 = vpop.f32.mrb[25].mxu0  ;;  %804 = vst [vmem:[#allocation2 + $0x108] sm:$0xff] %v732_v52  ;;  %v1438_v54 = vpop.f32.mrb[25].mxu1 }
 0x131   : > { %v632_v1 = vpop.f32.mrb[26].mxu0  ;;  %v737_v2 = vpop.f32.mrb[26].mxu1 }
 0x132   : > { %784 = vst [vmem:[#allocation2 + $0x68] sm:$0xff] %v632_v1  ;;  %v1378_v4 = vpop.f32.mrb[27].mxu0  ;;  %805 = vst [vmem:[#allocation2 + $0x110] sm:$0xff] %v737_v2  ;;  %v1441_v5 = vpop.f32.mrb[27].mxu1 }
 0x135   : > { %v637_v7 = vpop.f32.mrb[28].mxu0  ;;  %v742_v8 = vpop.f32.mrb[28].mxu1 }
 0x136   : > { %785 = vst [vmem:[#allocation2 + $0x70] sm:$0xff] %v637_v7  ;;  %v1381_v9 = vpop.f32.mrb[29].mxu0  ;;  %806 = vst [vmem:[#allocation2 + $0x118] sm:$0xff] %v742_v8  ;;  %v1444_v10 = vpop.f32.mrb[29].mxu1 }
 0x139   : > { %v642_v11 = vpop.f32.mrb[30].mxu0  ;;  %v747_v12 = vpop.f32.mrb[30].mxu1 }
 0x13a   : > { %786 = vst [vmem:[#allocation2 + $0x78] sm:$0xff] %v642_v11  ;;  %v1384_v13 = vpop.f32.mrb[31].mxu0  ;;  %807 = vst [vmem:[#allocation2 + $0x120] sm:$0xff] %v747_v12  ;;  %v1447_v14 = vpop.f32.mrb[31].mxu1 }
 0x13d   : > { %v647_v15 = vpop.f32.mrb[32].mxu0  ;;  %v752_v16 = vpop.f32.mrb[32].mxu1 }
 0x13e   : > { %787 = vst [vmem:[#allocation2 + $0x80] sm:$0xff] %v647_v15  ;;  %v1387_v17 = vpop.f32.mrb[33].mxu0  ;;  %808 = vst [vmem:[#allocation2 + $0x128] sm:$0xff] %v752_v16  ;;  %v1450_v18 = vpop.f32.mrb[33].mxu1 }
 0x141   : > { %v652_v19 = vpop.f32.mrb[34].mxu0  ;;  %v757_v20 = vpop.f32.mrb[34].mxu1 }
 0x142   : > { %788 = vst [vmem:[#allocation2 + $0x88] sm:$0xff] %v652_v19  ;;  %v1390_v21 = vpop.f32.mrb[35].mxu0  ;;  %809 = vst [vmem:[#allocation2 + $0x130] sm:$0xff] %v757_v20  ;;  %v1453_v22 = vpop.f32.mrb[35].mxu1 }
 0x145   : > { %v657_v23 = vpop.f32.mrb[36].mxu0  ;;  %v762_v24 = vpop.f32.mrb[36].mxu1 }
 0x146   : > { %789 = vst [vmem:[#allocation2 + $0x90] sm:$0xff] %v657_v23  ;;  %v1393_v25 = vpop.f32.mrb[37].mxu0  ;;  %810 = vst [vmem:[#allocation2 + $0x138] sm:$0xff] %v762_v24  ;;  %v1456_v26 = vpop.f32.mrb[37].mxu1 }
 0x149   : > { %v662_v27 = vpop.f32.mrb[38].mxu0  ;;  %v767_v28 = vpop.f32.mrb[38].mxu1 }
 0x14a   : > { %790 = vst [vmem:[#allocation2 + $0x98] sm:$0xff] %v662_v27  ;;  %v1396_v29 = vpop.f32.mrb[39].mxu0  ;;  %811 = vst [vmem:[#allocation2 + $0x140] sm:$0xf] %v767_v28  ;;  %v1459_v30 = vpop.f32.mrb[39].mxu1 }
 0x14d   : > { %v667_v31 = vpop.f32.mrb[40].mxu0 }
 0x14e   : > { %791 = vst [vmem:[#allocation2 + $0xa0] sm:$0xff] %v667_v31  ;;  %v1399_v32 = vpop.f32.mrb[41].mxu0 }
 0x14f LB: >> { %s828_s26 = smul.u32 9, %s1671_s25  ;;  %s1254_s24 = sshll.u32 %s1671_s25, 3  ;;  %s1671_s25 = sphi %s2042_s25, %s827_s25  }
 0x150   : >> { %s940_s12 = scalar_lea.vmem %s2039_s21, %s1254_s24 [#allocation3]  ;;  %s827_s25 = sadd.s32 1, %s1671_s25  }
 0x151   : >> { %s829_s10 = scalar_lea.vmem [#allocation2], %s828_s26  ;;  %p824_p11 = scmp.ge.s32.totalorder %s827_s25, 8  }
 0x152   : > { %1491 = vmatprep.subr.bf16.mxu1 (%p824_p11), %v1673_v3  ;;  %v942_v8 = vld [vmem:[%s2191_s5] sm:$0xff] (%p824_p11)  ;;  %v943_v9 = vld [vmem:[%s2191_s5 + $0x8] sm:$0xff] (%p824_p11)  ;;  %v944_v10 = vld [vmem:[%s2191_s5 + $0x10] sm:$0xff] (%p824_p11)  ;;  %1476 = vmatprep.mubr.msk.f32.mxu1 (%p824_p11), %vm1674_vm0, %v1675_v6  ;;  %s2201_s13 = scalar_lea.vmem (%p824_p11), %s2190_s4, %s1805_s19  ;;  %s1262_s18 = sshll.u32 (%p824_p11), %s1746_s9, 10 }
 0x153   : > { %v1492_v11 = vpack.c.bf16 (%p824_p11), %v943_v9, %v942_v8  ;;  %v947_v6 = vld [vmem:[%s2191_s5 + $0x28] sm:$0xff] (%p824_p11)  ;;  %s1044_s22 = sshll.u32 (%p824_p11), %s2039_s21, 4  ;;  %s2104_s23 = scalar_lea.hbm (%p824_p11), %s2193_s7, %s1262_s18  ;;  %s2106_s22 = int_to_ptr.vmem [resolvable:$true] %s1044_s22 }
 0x154   : > { %s1569_s25 = scalar_lea.vmem (%p824_p11), %s2106_s22, 1024  ;;  %s1676_s19 = smov (%p824_p11), [#allocation3]  }
 0x155   : >> { %v830_v33 = vld [vmem:[%s829_s10] sm:$0xff]  ;;  %v1237_v34 = vld [vmem:[%s829_s10 + $0x51] sm:$0xff]  ;;  %v1247_v46 = vld [vmem:[%s829_s10 + $0x9] sm:$0xff]  ;;  %1493 = vmatpush3.bf16.msra.mxu1 (%p824_p11), %v1492_v11  ;;  %p1570_p12 = scmp.ne.s32.totalorder (%p824_p11), %s2106_s22, %s1569_s25  ;;  %s1573_s24 = sshll.u32 (%p824_p11), %s1676_s19, 4  ;;  %s1574_s24 = int_to_ptr.vmem [resolvable:$false] %s1573_s24 }
 0x156   : >> { %v1239_v35 = vld [vmem:[%s829_s10 + $0x1] sm:$0xff]  ;;  %v837_v36 = vmul.f32 %v1990_v55, %v830_v33  ;;  %v849_v37 = vmul.f32 %v1995_v56, %v1237_v34  ;;  %v1243_v40 = vld [vmem:[%s829_s10 + $0xf3] sm:$0xff]  ;;  %v907_v51 = vmul.f32 %v2020_v61, %v1247_v46  ;;  %v1251_v52 = vld [vmem:[%s829_s10 + $0xa] sm:$0xff]  ;;  %1494 = vmatprep.subr.bf16.mxu1 (%p824_p11), %v1673_v3  ;;  %s1575_s21 = scalar_lea.vmem (%p824_p11), %s1574_s24, 2048  ;;  %p1576_p1 = scmp.lt.s32.totalorder (%p824_p11), %s2106_s22, %s1574_s24 }
 0x157   : >> { %v860_v38 = vmul.f32 %v2000_v57, %v1239_v35  ;;  %v1241_v39 = vld [vmem:[%s829_s10 + $0xa2] sm:$0xff]  ;;  %v884_v45 = vmul.f32 %v2010_v59, %v1243_v40  ;;  %v1249_v49 = vld [vmem:[%s829_s10 + $0x5a] sm:$0xff]  ;;  %v930_v2 = vmul.f32 %v2030_v63, %v1251_v52  ;;  %v948_v59 = vld [vmem:[%s2191_s5 + $0x30] sm:$0xff] (%p824_p11)  ;;  %p1571_p13 = pnand (%p824_p11), %p1570_p12, %p1763_p5  ;;  %p1577_p2 = scmp.lt.s32.totalorder (%p824_p11), %s1575_s21, %s1569_s25 }
 0x158   : >> { %v850_v41 = vadd.f32 %v849_v37, %v837_v36  ;;  %v872_v42 = vmul.f32 %v2005_v58, %v1241_v39  ;;  %v1245_v43 = vld [vmem:[%s829_s10 + $0xa3] sm:$0xff]  ;;  %v919_v54 = vmul.f32 %v2025_v62, %v1249_v49  ;;  %v945_v55 = vld [vmem:[%s2191_s5 + $0x18] sm:$0xff] (%p824_p11)  ;;  %v951_v62 = vld [vmem:[%s2201_s13] sm:$0x1] (%p824_p11)  ;;  %s1027_s10 = scalar_lea.sflag (%p824_p11), [#allocation4], %s1774_s17 }
 0x159   : >> { %v895_v48 = vmul.f32 %v2015_v60, %v1245_v43  ;;  %v1495_v56 = vpack.c.bf16 (%p824_p11), %v945_v55, %v944_v10  ;;  %v946_v57 = vld [vmem:[%s2191_s5 + $0x20] sm:$0xff] (%p824_p11)  ;;  %v949_v60 = vld [vmem:[%s2191_s5 + $0x38] sm:$0xff] (%p824_p11)  ;;  %p1572_p0 = pneg (%p824_p11), %p1571_p13  ;;  %p1578_p3 = por (%p824_p11), %p1577_p2, %p1576_p1 }
 0x15a   : >> { %v861_v44 = vadd.f32 %v860_v38, %v850_v41  ;;  %v1498_v58 = vpack.c.bf16 (%p824_p11), %v947_v6, %v946_v57  ;;  %v1501_v61 = vpack.c.bf16 (%p824_p11), %v949_v60, %v948_v59 }
 0x15b   : > { %1496 = vmatpush3.bf16.msra.mxu1 (%p824_p11), %v1495_v56  ;;  %p1579_p4 = pnand (%p824_p11), %p1578_p3, %p1572_p0 }
 0x15c   : >> { %v873_v47 = vadd.f32 %v872_v42, %v861_v44  ;;  %1497 = vmatprep.subr.bf16.mxu1 (%p824_p11), %v1673_v3 }
 0x15e   : >> { %v885_v50 = vadd.f32 %v884_v45, %v873_v47 }
 0x15f   : > { %1499 = vmatpush3.bf16.msra.mxu1 (%p824_p11), %v1498_v58 }
 0x160   : >> { %v896_v53 = vadd.f32 %v895_v48, %v885_v50  ;;  %1500 = vmatprep.subr.bf16.mxu1 (%p824_p11), %v1673_v3 }
 0x162   : >> { %v908_v1 = vadd.f32 %v907_v51, %v896_v53 }
 0x163   : > { %1502 = vmatpush3.bf16.msra.mxu1 (%p824_p11), %v1501_v61 }
 0x164   : >> { %v920_v4 = vadd.f32 %v919_v54, %v908_v1  ;;  %826 = sbr.rel (!%p824_p11) target bundleno = 335 (0x14f), region = 120 }
 0x166   : >> { %v931_v5 = vadd.f32 %v930_v2, %v920_v4  ;;  %1477 = vmatmul.mubr.msk.f32.vlgmr.msra.gmra.mrb[40].mxu1 (%p824_p11), %vm377_vm1, %v951_v62 }
 0x168   : >> { %v938_v7 = vadd.f32 %v2035_v0, %v931_v5 }
 0x16a   : >> { %941 = vst [vmem:[%s940_s12] sm:$0xff] %v938_v7 }
 0x16b   : > { %1582 = shalt.err (!%p1579_p4)
}
 0x16c   : > { %s1583_s12 = scalar_lea.hbm %s2104_s23, 1024  ;;  %s1587_s20 = scalar_lea.hbm %s2193_s7, 2048 }
 0x16d   : > { %p1584_p7 = scmp.ne.s32.totalorder %s2104_s23, %s1583_s12  ;;  %p1588_p10 = scmp.lt.u32.totalorder %s2104_s23, %s2193_s7 }
 0x16e   : > { %p1589_p11 = scmp.lt.u32.totalorder %s1587_s20, %s1583_s12  ;;  %p1591_p13 = scmp.lt.u32.totalorder %s1583_s12, %s2104_s23 }
 0x16f   : > { %p1585_p8 = pnand %p1584_p7, %p1763_p5 }
 0x170   : > { %p1590_p12 = por %p1589_p11, %p1588_p10 }
 0x171   : > { %p1586_p9 = pneg %p1585_p8 }
 0x172   : > { %p1592_p0 = por %p1591_p13, %p1590_p12 }
 0x174   : > { %p1593_p1 = pnand %p1592_p0, %p1586_p9 }
 0x176   : > { %1596 = shalt.err (!%p1593_p1)
}
 0x177   : > { %s1677_s25 = smov 128   ;;  %s1678_s24 = smov 8   ;;  %v950_v3 = vld [vmem:[%s2192_s6] sm:$0x1] }
 0x178   : > { %1512 = dma.vmem_to_hbm [thread:$0]  (%p1763_p5), %s2106_s22, 1024, %s2104_s23, %s1027_s10, %s1677_s25, %s1677_s25, %s1678_s24  }
 0x179   : > { %s1259_s12 = sshll.u32 %s1746_s9, 4  ;;  %s2202_s18 = scalar_lea.vmem [#allocation5], %s1774_s17 }
 0x17a   : > { %s1060_s20 = sshll.u32 %s2202_s18, 4  ;;  %s2141_s0 = scalar_lea.hbm %s2194_s8, %s1259_s12  ;;  %s2143_s20 = int_to_ptr.vmem [resolvable:$true] %s1060_s20 }
 0x17b   : > { %s2203_s1 = smov %s2202_s18  ;;  %s1032_s23 = scalar_lea.sflag [#allocation6], %s1774_s17 }
 0x17c   : > { %s1597_s22 = scalar_lea.vmem %s2143_s20, 16  ;;  %s1679_s9 = smov [#allocation5]  }
 0x17d   : > { %p1598_p2 = scmp.ne.s32.totalorder %s2143_s20, %s1597_s22  ;;  %s1601_s10 = sshll.u32 %s1679_s9, 4  ;;  %s1602_s10 = int_to_ptr.vmem [resolvable:$false] %s1601_s10 }
 0x17e   : > { %s1603_s25 = scalar_lea.vmem %s1602_s10, 32  ;;  %p1604_p7 = scmp.lt.s32.totalorder %s2143_s20, %s1602_s10 }
 0x17f   : > { %p1599_p3 = pnand %p1598_p2, %p1763_p5  ;;  %p1605_p8 = scmp.lt.s32.totalorder %s1603_s25, %s1597_s22 }
 0x181   : > { %p1600_p4 = pneg %p1599_p3  ;;  %p1606_p9 = por %p1605_p8, %p1604_p7 }
 0x183   : > { %p1607_p10 = pnand %p1606_p9, %p1600_p4 }
 0x239   : > { %v1021_v63 = vpop.f32.mrb[40].mxu1 }
 0x23a   : > { %v1022_v0 = vadd.f32 %v1021_v63, %v950_v3  ;;  %v1478_v12 = vpop.f32.mrb[41].mxu1 }
 0x23c   : > { %1025 = vst [vmem:[%s2203_s1] sm:$0x1] %v1022_v0 }
 0x23d   : > { %1610 = shalt.err (!%p1607_p10)
}
 0x23e   : > { %s1611_s1 = scalar_lea.hbm %s2141_s0, 16  ;;  %s1615_s21 = scalar_lea.hbm %s2194_s8, 32 }
 0x23f   : > { %p1612_p11 = scmp.ne.s32.totalorder %s2141_s0, %s1611_s1  ;;  %p1616_p0 = scmp.lt.u32.totalorder %s2141_s0, %s2194_s8 }
 0x240   : > { %p1617_p1 = scmp.lt.u32.totalorder %s1615_s21, %s1611_s1  ;;  %p1619_p3 = scmp.lt.u32.totalorder %s1611_s1, %s2141_s0 }
 0x241   : > { %p1613_p12 = pnand %p1612_p11, %p1763_p5 }
 0x242   : > { %p1618_p2 = por %p1617_p1, %p1616_p0 }
 0x243   : > { %p1614_p13 = pneg %p1613_p12 }
 0x244   : > { %p1620_p4 = por %p1619_p3, %p1618_p2 }
 0x246   : > { %p1621_p7 = pnand %p1620_p4, %p1614_p13 }
 0x248   : > { %1624 = shalt.err (!%p1621_p7)
}
 0x249   : > { %1513 = dma.vmem_to_hbm [thread:$0]  (%p1763_p5), %s2143_s20, 16, %s2141_s0, %s1032_s23  }
 0x24a PF: > { %p1523_p8 = scmp.ge.s32.totalorder %s1667_s30, 2  ;;  %s1072_s18 = sand.u32 1, %s1655_s27  }
 0x24b   : > { %s1073_s26 = scalar_lea.sflag [#allocation4], %s1072_s18 }
 0x24c   : > { %p1517_p9 = pnand %p1523_p8, %p1767_p6 }
 0x24e   : > { %1646 = dma.done.wait (!%p1517_p9), %s1073_s26, 1024  }
 0x24f   : > { %1648 = vsyncadd (!%p1517_p9), %s1073_s26, 4294966272  ;;  %s1082_s19 = scalar_lea.sflag [#allocation6], %s1072_s18 }
 0x250   : > { %1650 = dma.done.wait (!%p1517_p9), %s1082_s19, 16  }
 0x251   : > { %1652 = vsyncadd (!%p1517_p9), %s1082_s19, 4294967280  ;;  %p22_p5 = scmp.ge.s32.totalorder %s1750_s11, 4   ;;  %s2204_s27 = smov %s1659_s28 }
 0x252   : > { %s2205_s28 = smov %s1663_s29  ;;  %s2206_s29 = smov %s1761_s14 }
 0x253   : > { %s2207_s30 = smov %s1750_s11  ;;  %24 = sbr.rel (!%p22_p5) target bundleno = 8 (0x8), region = 131 }
 0x25a   :  { %1086 = vsyncpa [#allocation4], 1 }
 0x25b   :  { %1088 = vsyncpa [#allocation4 + $0x1], 1 }
 0x25c   :  { %1089 = vsyncpa [#allocation6], 1 }
 0x25d   :  { %1091 = vsyncpa [#allocation6 + $0x1], 1 }

</bundles_post_ra>
